<compile_context>
chip_gen: v5e
topology: v5e:2x2
jax: 0.10.0
libtpu: 0.0.40
codegen_flags: <defaults>
</compile_context>

<pallas_src>
import jax
import jax.numpy as jnp
from jax.experimental import pallas as pl
from jax.experimental.pallas import tpu as pltpu

_MiB = 1024 * 1024


def _round_up(x, m):
    return ((x + m - 1) // m) * m


# --------------------------------------------------------------------------------------
# Kernel
# --------------------------------------------------------------------------------------
def ffn_kernel(x_ref, w1_ref, b1_ref, w2_ref, b2_ref, o_ref, acc_ref):
    """One (row-tile i, hidden-tile f) grid step.

    x_ref:   (TM, Ep) compute_dtype      w1_ref: (Ep, TF) compute_dtype
    b1_ref:  (1, TF)  f32                w2_ref: (TF, Ep) compute_dtype
    b2_ref:  (1, Ep)  f32                o_ref:  (TM, Ep) out_dtype
    acc_ref: (TM, Ep) f32 scratch, carried across the F (last, "arbitrary") grid axis.
    """
    f = pl.program_id(1)

    @pl.when(f == 0)
    def _():
        acc_ref[...] = jnp.zeros_like(acc_ref)

    # First linear (partial over the hidden dim) + bias + ReLU, in f32.
    h = jnp.dot(x_ref[...], w1_ref[...], preferred_element_type=jnp.float32)
    h = jnp.maximum(h + b1_ref[...], 0.0)
    # Dropout: module evaluated in inference mode -> identity.
    # TODO(synk): training-mode dropout would use pltpu.prng_seed / pltpu.prng_random_bits.

    # Second linear: accumulate this hidden-tile's contribution.
    acc_ref[...] += jnp.dot(h.astype(w2_ref.dtype), w2_ref[...],
                            preferred_element_type=jnp.float32)

    @pl.when(f == pl.num_programs(1) - 1)
    def _():
        o_ref[...] = (acc_ref[...] + b2_ref[...]).astype(o_ref.dtype)


# --------------------------------------------------------------------------------------
# Parameter prep (hoisted out of the per-call path)
# --------------------------------------------------------------------------------------
def prepare_ffn_params(w1, b1, w2, b2, compute_dtype=jnp.bfloat16):
    """Pad weights to lane-dense (128-multiple) shapes and cast once at init.

    w1: (E, F), b1: (F,), w2: (F, E), b2: (E,).  compute_dtype=jnp.float32 gives exact
    nn.Linear parity at lower MXU throughput; bf16 is the fast path.
    """
    E, F = w1.shape
    Ep, Fp = _round_up(E, 128), _round_up(F, 128)

    def pad2(a, rows, cols):
        if a.shape == (rows, cols):
            return a
        return jnp.zeros((rows, cols), a.dtype).at[:a.shape[0], :a.shape[1]].set(a)

    return dict(
        w1=pad2(w1, Ep, Fp).astype(compute_dtype),
        b1=pad2(b1.astype(jnp.float32).reshape(1, F), 1, Fp),
        w2=pad2(w2, Fp, Ep).astype(compute_dtype),
        b2=pad2(b2.astype(jnp.float32).reshape(1, E), 1, Ep),
        E=E, F=F, Ep=Ep, Fp=Fp, compute_dtype=compute_dtype,
    )


# --------------------------------------------------------------------------------------
# Tiling / VMEM budgeting
# --------------------------------------------------------------------------------------
def _vmem_budget_and_limit():
    kind = ""
    try:
        kind = jax.devices()[0].device_kind.lower()
    except Exception:  # pragma: no cover - defensive
        pass
    if "v7" in kind:                      # 64 MiB physical per TensorCore: leave headroom
        return 40 * _MiB, 56 * _MiB
    if "v6" in kind or "v5" in kind:      # 128 MiB physical VMEM
        return 80 * _MiB, 100 * _MiB
    return 40 * _MiB, 64 * _MiB           # conservative fallback (v4 etc.)


def _vmem_bytes(TM, TF, Ep, cd_size, out_size):
    return (2 * TM * Ep * cd_size         # x tile, double-buffered
            + 2 * TM * Ep * out_size      # out tile, double-buffered
            + TM * Ep * 4                 # f32 accumulator scratch
            + 2 * Ep * TF * cd_size       # w1 tile, double-buffered
            + 2 * TF * Ep * cd_size       # w2 tile, double-buffered
            + 2 * (TF + Ep) * 4           # biases, double-buffered
            + 2 * TM * TF * 4)            # ReLU intermediate / compiler temporaries


def _choose_tiles(M, Ep, Fp, tile_m, tile_f, budget, cd_size, out_size):
    TM = min(tile_m, _round_up(M, 16))    # 16-row granularity (bf16 sublane packing)
    while True:
        cap = tile_f if tile_f is not None else min(Fp, 2048)
        TF = max(128, (min(cap, Fp) // 128) * 128)
        # TF must evenly divide the 128-padded Fp: a ragged hidden tile would feed
        # garbage into the reduction.  Shrink until it divides and fits the budget.
        while TF > 128 and (Fp % TF != 0
                            or _vmem_bytes(TM, TF, Ep, cd_size, out_size) > budget):
            TF -= 128
        if _vmem_bytes(TM, TF, Ep, cd_size, out_size) <= budget or TM <= 64:
            return TM, TF
        TM = max(64, (TM // 2 // 16) * 16)


# --------------------------------------------------------------------------------------
# Wrapper
# --------------------------------------------------------------------------------------
def feed_forward(x, params, *, tile_m=512, tile_f=None,
                 out_dtype=jnp.float32, vmem_budget_bytes=None):
    """x: (B, S, E) -> (B, S, E).  params from prepare_ffn_params()."""
    B, S, E = x.shape
    assert E == params["E"], (E, params["E"])
    Ep, Fp = params["Ep"], params["Fp"]
    cdt = params["compute_dtype"]
    cd_size = jnp.dtype(cdt).itemsize
    out_size = jnp.dtype(out_dtype).itemsize
    M = B * S

    budget, vmem_limit = _vmem_budget_and_limit()
    if vmem_budget_bytes is not None:
        budget = vmem_budget_bytes
        vmem_limit = max(vmem_limit, budget + 8 * _MiB)

    TM, TF = _choose_tiles(M, Ep, Fp, tile_m, tile_f, budget, cd_size, out_size)
    Mp = max(M, TM)                 # pad tiny M up to one tile; larger ragged M is masked
    grid_m = pl.cdiv(Mp, TM)
    grid_f = Fp // TF

    x2d = x.reshape(M, E)
    if (Mp, Ep) != (M, E):          # only pad activations when dims are not aligned
        x2d = jnp.zeros((Mp, Ep), x.dtype).at[:M, :E].set(x2d)
    x2d = x2d.astype(cdt)

    cost = pl.CostEstimate(
        flops=4 * M * Ep * Fp,                                   # two matmuls
        transcendentals=0,
        bytes_accessed=(Mp * Ep * cd_size                        # x in
                        + grid_m * 2 * Ep * Fp * cd_size         # weights per row tile
                        + (Fp + Ep) * 4                          # biases
                        + Mp * Ep * out_size),                   # out
    )

    out2d = pl.pallas_call(
        ffn_kernel,
        out_shape=jax.ShapeDtypeStruct((Mp, Ep), out_dtype),
        grid_spec=pltpu.PrefetchScalarGridSpec(
            num_scalar_prefetch=0,
            grid=(grid_m, grid_f),
            in_specs=[
                pl.BlockSpec((TM, Ep), lambda i, f: (i, 0)),   # x: resident across f
                pl.BlockSpec((Ep, TF), lambda i, f: (0, f)),   # w1: streamed over f
                pl.BlockSpec((1, TF), lambda i, f: (0, f)),    # b1: streamed over f
                pl.BlockSpec((TF, Ep), lambda i, f: (f, 0)),   # w2: streamed over f
                # NOTE: pipeline_mode=pl.Buffered(1) on the constant-index blocks would
                # halve their VMEM further; left at default double-buffering for
                # portability across jax versions (F-tiling already bounds VMEM).
                pl.BlockSpec((1, Ep), lambda i, f: (0, 0)),    # b2: constant
            ],
            out_specs=pl.BlockSpec((TM, Ep), lambda i, f: (i, 0)),
            scratch_shapes=[pltpu.VMEM((TM, Ep), jnp.float32)],
        ),
        compiler_params=pltpu.CompilerParams(
            # Row tiles are independent (megacore sharding on v7x); F is a carried
            # reduction, so it must be "arbitrary" and last.
            dimension_semantics=("parallel", "arbitrary"),
            vmem_limit_bytes=vmem_limit,
        ),
        cost_estimate=cost,
    )(x2d, params["w1"], params["b1"], params["w2"], params["b2"])

    if (Mp, Ep) != (M, E):
        out2d = out2d[:M, :E]
    return out2d.reshape(B, S, E)


def init_params(key, emb_dim, ff_dim):
    """Deterministic init matching nn.Linear's U(-1/sqrt(fan_in), 1/sqrt(fan_in))."""
    k1, k2, k3, k4 = jax.random.split(key, 4)
    bound1 = 1.0 / (emb_dim ** 0.5)
    bound2 = 1.0 / (ff_dim ** 0.5)
    # Stored transposed relative to torch ((in, out) instead of (out, in)).
    w1 = jax.random.uniform(k1, (emb_dim, ff_dim), jnp.float32, -bound1, bound1)
    b1 = jax.random.uniform(k2, (ff_dim,), jnp.float32, -bound1, bound1)
    w2 = jax.random.uniform(k3, (ff_dim, emb_dim), jnp.float32, -bound2, bound2)
    b2 = jax.random.uniform(k4, (emb_dim,), jnp.float32, -bound2, bound2)
    return w1, b1, w2, b2


if __name__ == "__main__":
    key = jax.random.PRNGKey(0)

    def run_case(B, S, E, F, tile_f=None):
        kx, kp = jax.random.split(jax.random.fold_in(key, 1000 * E + F))
        x = jax.random.normal(kx, (B, S, E), dtype=jnp.float32)
        w1, b1, w2, b2 = init_params(kp, E, F)
        params = prepare_ffn_params(w1, b1, w2, b2)          # hoisted weight prep
        out = feed_forward(x, params, tile_f=tile_f)
        jax.block_until_ready(out)
        ref = jnp.maximum(x @ w1 + b1, 0.0) @ w2 + b2        # eval-mode dropout = identity
        assert out.shape == (B, S, E)
        err = float(jnp.max(jnp.abs(out - ref)))
        # Tolerance accounts for bf16 MXU operands (use compute_dtype=f32 for parity).
        assert jnp.allclose(out, ref, atol=5e-2, rtol=5e-2), err
        return err

    run_case(2, 8, 32, 64)                  # unaligned dims -> padded path, single F tile
    run_case(2, 8, 128, 256, tile_f=128)    # aligned dims (no pad/slice), 2 F tiles -> accumulator
    print("KERNEL_OK")
</pallas_src>

<mosaic_0001>
module attributes {stable_mosaic.version = 11 : i64} {
  func.func @ffn_kernel(%arg0: i32, %arg1: i32, %arg2: memref<16x128xbf16, #tpu.memory_space<vmem>>, %arg3: memref<128x128xbf16, #tpu.memory_space<vmem>>, %arg4: memref<1x128xf32, #tpu.memory_space<vmem>>, %arg5: memref<128x128xbf16, #tpu.memory_space<vmem>>, %arg6: memref<1x128xf32, #tpu.memory_space<vmem>>, %arg7: memref<16x128xf32, #tpu.memory_space<vmem>>, %arg8: memref<16x128xf32, #tpu.memory_space<vmem>>) attributes {dimension_semantics = [#tpu.dimension_semantics<parallel>, #tpu.dimension_semantics<arbitrary>], iteration_bounds = array<i64: 1, 1>, scalar_prefetch = 0 : i64, scratch_operands = 1 : i64, tpu.core_type = #tpu.core_type<tc>, window_params = [{transform_indices = @transform_0, window_bounds = array<i64: 16, 128>}, {transform_indices = @transform_1, window_bounds = array<i64: 128, 128>}, {transform_indices = @transform_2, window_bounds = array<i64: 1, 128>}, {transform_indices = @transform_3, window_bounds = array<i64: 128, 128>}, {pipeline_mode = #tpu.pipeline_mode<synchronous>, transform_indices = @transform_4, window_bounds = array<i64: 1, 128>}, {transform_indices = @transform_5, window_bounds = array<i64: 16, 128>}]} {
    %c0_i32 = arith.constant 0 : i32
    %0 = arith.cmpi eq, %arg1, %c0_i32 : i32
    %1 = arith.extui %0 : i1 to i32
    %c0_i32_0 = arith.constant 0 : i32
    %2 = arith.cmpi ne, %1, %c0_i32_0 : i32
    scf.if %2 {
      %cst_16 = arith.constant 0.000000e+00 : f32
      %20 = vector.broadcast %cst_16 : f32 to vector<16x128xf32>
      %c0_17 = arith.constant 0 : index
      %c0_18 = arith.constant 0 : index
      %21 = vector.load %arg8[%c0_17, %c0_18] : memref<16x128xf32, #tpu.memory_space<vmem>>, vector<16x128xf32>
      tpu.vector_store %arg8[%c0_17, %c0_18], %20 {strides = array<i32>} : memref<16x128xf32, #tpu.memory_space<vmem>>, vector<16x128xf32>,
    } else {
    }
    %c0 = arith.constant 0 : index
    %c0_1 = arith.constant 0 : index
    %3 = vector.load %arg2[%c0, %c0_1] : memref<16x128xbf16, #tpu.memory_space<vmem>>, vector<16x128xbf16>
    %c0_2 = arith.constant 0 : index
    %c0_3 = arith.constant 0 : index
    %4 = vector.load %arg3[%c0_2, %c0_3] : memref<128x128xbf16, #tpu.memory_space<vmem>>, vector<128x128xbf16>
    %cst = arith.constant dense<0.000000e+00> : vector<16x128xf32>
    %5 = tpu.matmul %3, %4, %cst {dimension_numbers = #tpu.dot_dimension_numbers<[1], [0], [0], [1], [0, 0, 1, 1], [], []>} : vector<16x128xbf16>, vector<128x128xbf16>, vector<16x128xf32> -> vector<16x128xf32>
    %c0_4 = arith.constant 0 : index
    %c0_5 = arith.constant 0 : index
    %6 = vector.load %arg4[%c0_4, %c0_5] : memref<1x128xf32, #tpu.memory_space<vmem>>, vector<1x128xf32>
    %7 = vector.broadcast %6 : vector<1x128xf32> to vector<16x128xf32>
    %8 = arith.addf %5, %7 : vector<16x128xf32>
    %cst_6 = arith.constant 0.000000e+00 : f32
    %9 = vector.broadcast %cst_6 : f32 to vector<16x128xf32>
    %10 = arith.maximumf %8, %9 : vector<16x128xf32>
    %c0_7 = arith.constant 0 : index
    %c0_8 = arith.constant 0 : index
    %11 = vector.load %arg8[%c0_7, %c0_8] : memref<16x128xf32, #tpu.memory_space<vmem>>, vector<16x128xf32>
    %12 = arith.truncf %10 : vector<16x128xf32> to vector<16x128xbf16>
    %c0_9 = arith.constant 0 : index
    %c0_10 = arith.constant 0 : index
    %13 = vector.load %arg5[%c0_9, %c0_10] : memref<128x128xbf16, #tpu.memory_space<vmem>>, vector<128x128xbf16>
    %cst_11 = arith.constant dense<0.000000e+00> : vector<16x128xf32>
    %14 = tpu.matmul %12, %13, %cst_11 {dimension_numbers = #tpu.dot_dimension_numbers<[1], [0], [0], [1], [0, 0, 1, 1], [], []>} : vector<16x128xbf16>, vector<128x128xbf16>, vector<16x128xf32> -> vector<16x128xf32>
    %15 = arith.addf %11, %14 : vector<16x128xf32>
    %c0_12 = arith.constant 0 : index
    %c0_13 = arith.constant 0 : index
    %16 = vector.load %arg8[%c0_12, %c0_13] : memref<16x128xf32, #tpu.memory_space<vmem>>, vector<16x128xf32>
    tpu.vector_store %arg8[%c0_12, %c0_13], %15 {strides = array<i32>} : memref<16x128xf32, #tpu.memory_space<vmem>>, vector<16x128xf32>,
    %c0_i32_14 = arith.constant 0 : i32
    %17 = arith.cmpi eq, %arg1, %c0_i32_14 : i32
    %18 = arith.extui %17 : i1 to i32
    %c0_i32_15 = arith.constant 0 : i32
    %19 = arith.cmpi ne, %18, %c0_i32_15 : i32
    scf.if %19 {
      %c0_16 = arith.constant 0 : index
      %c0_17 = arith.constant 0 : index
      %20 = vector.load %arg8[%c0_16, %c0_17] : memref<16x128xf32, #tpu.memory_space<vmem>>, vector<16x128xf32>
      %c0_18 = arith.constant 0 : index
      %c0_19 = arith.constant 0 : index
      %21 = vector.load %arg6[%c0_18, %c0_19] : memref<1x128xf32, #tpu.memory_space<vmem>>, vector<1x128xf32>
      %22 = vector.broadcast %21 : vector<1x128xf32> to vector<16x128xf32>
      %23 = arith.addf %20, %22 : vector<16x128xf32>
      %c0_20 = arith.constant 0 : index
      %c0_21 = arith.constant 0 : index
      %24 = vector.load %arg7[%c0_20, %c0_21] : memref<16x128xf32, #tpu.memory_space<vmem>>, vector<16x128xf32>
      tpu.vector_store %arg7[%c0_20, %c0_21], %23 {strides = array<i32>} : memref<16x128xf32, #tpu.memory_space<vmem>>, vector<16x128xf32>,
    } else {
    }
    return
  }
  func.func @transform_0(%arg0: i32, %arg1: i32) -> (i32, i32) {
    %c0_i32 = arith.constant 0 : i32
    %c0_i32_0 = arith.constant 0 : i32
    return %arg0, %c0_i32 : i32, i32
  }
  func.func @transform_1(%arg0: i32, %arg1: i32) -> (i32, i32) {
    %c0_i32 = arith.constant 0 : i32
    %c0_i32_0 = arith.constant 0 : i32
    return %c0_i32, %arg1 : i32, i32
  }
  func.func @transform_2(%arg0: i32, %arg1: i32) -> (i32, i32) {
    %c0_i32 = arith.constant 0 : i32
    %c0_i32_0 = arith.constant 0 : i32
    return %c0_i32, %arg1 : i32, i32
  }
  func.func @transform_3(%arg0: i32, %arg1: i32) -> (i32, i32) {
    %c0_i32 = arith.constant 0 : i32
    %c0_i32_0 = arith.constant 0 : i32
    return %arg1, %c0_i32 : i32, i32
  }
  func.func @transform_4(%arg0: i32, %arg1: i32) -> (i32, i32) {
    %c0_i32 = arith.constant 0 : i32
    %c0_i32_0 = arith.constant 0 : i32
    %c0_i32_1 = arith.constant 0 : i32
    return %c0_i32, %c0_i32_0 : i32, i32
  }
  func.func @transform_5(%arg0: i32, %arg1: i32) -> (i32, i32) {
    %c0_i32 = arith.constant 0 : i32
    %c0_i32_0 = arith.constant 0 : i32
    return %arg0, %c0_i32 : i32, i32
  }
}

</mosaic_0001>

<bundles_post_ra>
// kernel: tpu_custom_call.1
= control target key start
LH: loop header
LB: loop body
LE: loop exit
PB: predicated region body
PF: predicated region fallthrough
CT: control target
= control target key end

     0   :  { %10 = vsyncpa [#allocation4], 0  ;;  %s537_s0 = inlined_call_operand.hbm [shape: bf16[16,128], index: 0, kind: input, shape index: {}]   ;;  %s538_s1 = inlined_call_operand.hbm [shape: bf16[128,128], index: 1, kind: input, shape index: {}]   ;;  %s539_s2 = inlined_call_operand.vmem [shape: f32[1,128], index: 2, kind: input, shape index: {}]   ;;  %s540_s3 = inlined_call_operand.hbm [shape: bf16[128,128], index: 3, kind: input, shape index: {}]   ;;  %s541_s4 = inlined_call_operand.vmem [shape: f32[1,128], index: 4, kind: input, shape index: {}]   ;;  %s542_s5 = inlined_call_operand.hbm [shape: f32[16,128], index: 5, kind: output, shape index: {}]  }
   0x1   :  { %11 = vsyncpa [#allocation7], 0 }
   0x2   :  { %12 = vsyncpa [#allocation5], 0  ;;  %s30_s20 = sshll.u32 %s538_s1, 4  ;;  %s481_s21 = smov [#allocation6]   ;;  %s31_s20 = int_to_ptr.hbm [resolvable:$true] %s30_s20 }
   0x3   :  { %s32_s22 = sshll.u32 %s481_s21, 4  ;;  %s17_s25 = sshll.u32 %s537_s0, 4  ;;  %s33_s22 = int_to_ptr.vmem [resolvable:$true] %s32_s22  ;;  %s18_s25 = int_to_ptr.hbm [resolvable:$true] %s17_s25 }
   0x4   :  { %s482_s26 = smov 64   ;;  %s483_s27 = smov 4  }
   0x5   :  { %38 = dma.hbm_to_vmem [thread:$0]  %s31_s20, 1024, %s33_s22, [#allocation7], %s482_s26, %s482_s26, %s483_s27  }
   0x6   :  { %s484_s28 = smov [#allocation3]   ;;  %s45_s7 = sshll.u32 %s540_s3, 4  ;;  %s46_s7 = int_to_ptr.hbm [resolvable:$true] %s45_s7 }
   0x7   :  { %s19_s29 = sshll.u32 %s484_s28, 4  ;;  %s485_s1 = smov [#allocation8]   ;;  %s20_s29 = int_to_ptr.vmem [resolvable:$true] %s19_s29 }
   0x8   :  { %25 = dma.hbm_to_vmem [thread:$0]  %s18_s25, 128, %s20_s29, [#allocation4], %s482_s26, %s482_s26, %s483_s27  }
   0x9   :  { %s47_s8 = sshll.u32 %s485_s1, 4  ;;  %s48_s8 = int_to_ptr.vmem [resolvable:$true] %s47_s8 }
   0xa   :  { %53 = dma.hbm_to_vmem [thread:$0]  %s46_s7, 1024, %s48_s8, [#allocation7], %s482_s26, %s482_s26, %s483_s27  }
   0xb   :  { %475 = dma.done.wait [#allocation4], 128  }
   0xc   :  { %476 = vsyncadd [#allocation4], 4294967168 }
   0xd   :  { %477 = dma.done.wait [#allocation7], 2048  }
   0xe   :  { %478 = vsyncadd [#allocation7], 4294965248  ;;  %v360_v0 = vld [vmem:[#allocation6 + $0x38] sm:$0xff]  ;;  %v359_v1 = vld [vmem:[#allocation6 + $0x30] sm:$0xff]  ;;  %s486_s11 = smov [#allocation9]   ;;  %s487_s15 = smov 128  }
   0xf   :  { %150 = vmatpush.bf16.msra.mxu0 %v360_v0  ;;  %v368_v2 = vld [vmem:[#allocation8 + $0x38] sm:$0xff]  ;;  %v367_v3 = vld [vmem:[#allocation8 + $0x30] sm:$0xff]  ;;  %v358_v4 = vld [vmem:[#allocation6 + $0x28] sm:$0xff]  ;;  %s268_s12 = sshll.u32 %s486_s11, 4  ;;  %s488_s16 = smov 8   ;;  %s269_s12 = int_to_ptr.vmem [resolvable:$true] %s268_s12 }
  0x10   :  { %233 = vmatpush.bf16.msra.mxu1 %v368_v2  ;;  %v366_v5 = vld [vmem:[#allocation8 + $0x28] sm:$0xff]  ;;  %v357_v6 = vld [vmem:[#allocation6 + $0x20] sm:$0xff]  ;;  %v356_v8 = vld [vmem:[#allocation6 + $0x18] sm:$0xff] }
  0x11   :  { %v365_v7 = vld [vmem:[#allocation8 + $0x20] sm:$0xff]  ;;  %v355_v9 = vld [vmem:[#allocation6 + $0x10] sm:$0xff]  ;;  %v354_v10 = vld [vmem:[#allocation6 + $0x8] sm:$0xff] }
  0x12   :  { %v353_v11 = vld [vmem:[#allocation6] sm:$0xff]  ;;  %v352_v12 = vld [vmem:[#allocation3] sm:$0xff]  ;;  %v363_v14 = vld [vmem:[#allocation8 + $0x10] sm:$0xff] }
  0x13   :  { %151 = vmatpush.bf16.msra.mxu0 %v359_v1  ;;  %v364_v13 = vld [vmem:[#allocation8 + $0x18] sm:$0xff]  ;;  %v362_v15 = vld [vmem:[#allocation8 + $0x8] sm:$0xff]  ;;  %v361_v16 = vld [vmem:[#allocation8] sm:$0xff] }
  0x14   :  { %234 = vmatpush.bf16.msra.mxu1 %v367_v3  ;;  %v377_v18 = vld [vmem:[%s539_s2] ss:$0 sm:$0xff]  ;;  %s270_s2 = sshll.u32 %s542_s5, 4  ;;  %s271_s2 = int_to_ptr.hbm [resolvable:$true] %s270_s2 }
  0x15   :  { %v378_v25 = vld [vmem:[%s541_s4] ss:$0 sm:$0xff] }
  0x17   :  { %152 = vmatpush.bf16.msra.mxu0 %v358_v4 }
  0x18   :  { %235 = vmatpush.bf16.msra.mxu1 %v366_v5 }
  0x1b   :  { %153 = vmatpush.bf16.msra.mxu0 %v357_v6 }
  0x1c   :  { %236 = vmatpush.bf16.msra.mxu1 %v365_v7 }
  0x1f   :  { %154 = vmatpush.bf16.msra.mxu0 %v356_v8 }
  0x20   :  { %237 = vmatpush.bf16.msra.mxu1 %v364_v13 }
  0x23   :  { %155 = vmatpush.bf16.msra.mxu0 %v355_v9 }
  0x24   :  { %238 = vmatpush.bf16.msra.mxu1 %v363_v14 }
  0x27   :  { %156 = vmatpush.bf16.msra.mxu0 %v354_v10 }
  0x28   :  { %239 = vmatpush.bf16.msra.mxu1 %v362_v15 }
  0x2b   :  { %157 = vmatpush.bf16.msra.mxu0 %v353_v11 }
  0x2c   :  { %240 = vmatpush.bf16.msra.mxu1 %v361_v16 }
  0x2e   :  { %158 = vmatmul.bf16.vlgmr.msra.gmra.mxu0 %v352_v12 }
  0xab   :  { %v159_v17 = vpop.f32.mrf.mxu0 }
  0xac   :  { %v160_v19 = vadd.f32 %v377_v18, %v159_v17 }
  0xae   :  { %v164_v22 = vmax.f32 %v160_v19, 0.0 }
  0xb3   :  { %v161_v20 = vpop.f32.mrf.mxu0 }
  0xb4   :  { %v162_v21 = vadd.f32 %v377_v18, %v161_v20 }
  0xb6   :  { %v165_v23 = vmax.f32 %v162_v21, 0.0 }
  0xb8   :  { %v168_v24 = vpack.c.bf16 %v165_v23, %v164_v22 }
  0xba   :  { %241 = vmatmul.bf16.vlgmr.msra.gmra.mxu1 %v168_v24 }
 0x137   :  { %v242_v26 = vpop.f32.mrf.mxu1 }
 0x138   :  { %v260_v27 = vadd.f32 %v378_v25, %v242_v26 }
 0x13a   :  { %262 = vst [vmem:[#allocation9] sm:$0xff] %v260_v27 }
 0x13f   :  { %v244_v28 = vpop.f32.mrf.mxu1 }
 0x140   :  { %v261_v29 = vadd.f32 %v378_v25, %v244_v28 }
 0x142   :  { %263 = vst [vmem:[#allocation9 + $0x8] sm:$0xff] %v261_v29 }
 0x143   :  { %276 = dma.vmem_to_hbm [thread:$0]  %s269_s12, 256, %s271_s2, [#allocation5], %s487_s15, %s487_s15, %s488_s16  }
 0x144   :  { %479 = dma.done.wait [#allocation5], 256  }
 0x145   :  { %480 = vsyncadd [#allocation5], 4294967040 }
 0x146   :  { %281 = vsyncpa [#allocation4], 1 }
 0x147   :  { %282 = vsyncpa [#allocation7], 1 }
 0x148   :  { %283 = vsyncpa [#allocation5], 1 }

</bundles_post_ra>
